<compile_context>
chip_gen: v7x
topology: tpu7x:2x2x1
jax: 0.10.0
libtpu: 0.0.40
codegen_flags: <defaults>
</compile_context>

<pallas_src>
import functools

import jax
import jax.numpy as jnp
from jax.experimental import pallas as pl
from jax.experimental.pallas import tpu as pltpu


def _round_up(x, m):
    return (x + m - 1) // m * m


def mlp_kernel(x_ref, w_in_ref, b_in_ref, w_h_ref, b_h_ref,
               w_out_ref, b_out_ref, o_ref):
    # Input layer: (TB, In)@bf16 x (In, Dp)@bf16 -> f32 accumulate, f32 bias.
    h = jnp.dot(x_ref[...], w_in_ref[...],
                preferred_element_type=jnp.float32) + b_in_ref[...]

    # Hidden layers. Static unroll is fine at tiny L; for large L switch to
    # lax.fori_loop(..., unroll=True) to bound live ranges.
    num_layers = w_h_ref.shape[0]
    for i in range(num_layers):
        r = jnp.maximum(h, 0.0).astype(jnp.bfloat16)
        h = jnp.dot(r, w_h_ref[i],
                    preferred_element_type=jnp.float32) + b_h_ref[i]

    # Output layer + final ReLU. Lane-dense (128-lane padded), bf16 writeback.
    r = jnp.maximum(h, 0.0).astype(jnp.bfloat16)
    out = jnp.dot(r, w_out_ref[...],
                  preferred_element_type=jnp.float32) + b_out_ref[...]
    o_ref[...] = jnp.maximum(out, 0.0).astype(o_ref.dtype)


def prepare_torcerebro_params(w_in, b_in, w_h, b_h, w_out, b_out):
    """One-time layout prep: transpose, bf16-cast, and 128-lane pad weights.

    PyTorch convention W[out_features, in_features] comes in; the kernel then
    computes plain `x @ W_t` with no per-call XLA plumbing.
    """
    depth, n_in = w_in.shape
    n_layers = w_h.shape[0]
    n_out = w_out.shape[0]

    d_pad = _round_up(depth, 128)
    n_out_pad = _round_up(n_out, 128)

    # (In, Dp) bf16; padded columns are zero -> padded lanes of h are exactly 0.
    w_in_t = jnp.pad(w_in.T, ((0, 0), (0, d_pad - depth))).astype(jnp.bfloat16)
    b_in_p = jnp.pad(b_in, (0, d_pad - depth)).reshape(1, d_pad)          # f32

    # (L, Dp, Dp) bf16; zero rows/cols keep padded lanes at 0 through ReLU.
    w_h_t = jnp.pad(jnp.transpose(w_h, (0, 2, 1)),
                    ((0, 0), (0, d_pad - depth), (0, d_pad - depth))
                    ).astype(jnp.bfloat16)
    b_h_p = jnp.pad(b_h, ((0, 0), (0, d_pad - depth))
                    ).reshape(n_layers, 1, d_pad)                          # f32

    # (Dp, Npad) bf16; zero output columns are sliced off in the wrapper.
    w_out_t = jnp.pad(w_out.T, ((0, d_pad - depth), (0, n_out_pad - n_out))
                      ).astype(jnp.bfloat16)
    b_out_p = jnp.pad(b_out, (0, n_out_pad - n_out)).reshape(1, n_out_pad)  # f32

    params = (w_in_t, b_in_p, w_h_t, b_h_p, w_out_t, b_out_p)
    meta = dict(n_in=n_in, depth=depth, d_pad=d_pad, n_layers=n_layers,
                n_out=n_out, n_out_pad=n_out_pad)
    return params, meta


def torcerebro_apply(params, meta, x, *, block_batch=1024):
    """Runs the whole MLP in a single Pallas kernel call on prepped params."""
    w_in_t, b_in_p, w_h_t, b_h_p, w_out_t, b_out_p = params
    batch, n_in = x.shape
    assert n_in == meta["n_in"]
    d_pad = meta["d_pad"]
    n_layers = meta["n_layers"]
    n_out = meta["n_out"]
    n_out_pad = meta["n_out_pad"]

    # --- batch tiling ------------------------------------------------------
    # Minimize last-tile padding; force >= 2 parallel steps for moderate
    # batches so both v7x TensorCores are used (free on v5e/v6e).
    n_tiles = max(1, pl.cdiv(batch, block_batch))
    if n_tiles == 1 and batch >= 32:
        n_tiles = 2
    # Multiple of 16 keeps bf16 sublane tiling happy for any grid length.
    tb = _round_up(pl.cdiv(batch, n_tiles), 16)
    batch_pad = tb * n_tiles

    # bf16 input stream (half the HBM bytes of f32); padded rows are garbage
    # but sliced off below.
    x_p = x.astype(jnp.bfloat16)
    if batch_pad != batch:
        x_p = jnp.pad(x_p, ((0, batch_pad - batch), (0, 0)))

    grid = (n_tiles,)

    def _full(shape):
        # Whole-array block, same block every grid step (stays VMEM-resident).
        return pl.BlockSpec(shape, lambda i: (0,) * len(shape))

    out = pl.pallas_call(
        mlp_kernel,
        out_shape=jax.ShapeDtypeStruct((batch_pad, n_out_pad), jnp.bfloat16),
        grid=grid,
        in_specs=[
            pl.BlockSpec((tb, n_in), lambda i: (i, 0)),   # x (batch-tiled, bf16)
            _full((n_in, d_pad)),                         # w_in_t
            _full((1, d_pad)),                            # b_in (padded, f32)
            _full((n_layers, d_pad, d_pad)),              # w_h_t
            _full((n_layers, 1, d_pad)),                  # b_h (padded, f32)
            _full((d_pad, n_out_pad)),                    # w_out_t
            _full((1, n_out_pad)),                        # b_out (padded, f32)
        ],
        out_specs=pl.BlockSpec((tb, n_out_pad), lambda i: (i, 0)),
        compiler_params=pltpu.CompilerParams(
            dimension_semantics=("parallel",),
            # Explicit budget: resident padded weights (~100s of KiB) plus
            # double-buffered x / output tiles fit with huge headroom even
            # under v7x's 64 MiB physical / 32 MiB scoped default.
            vmem_limit_bytes=32 * 1024 * 1024),
    )(x_p, w_in_t, b_in_p, w_h_t, b_h_p, w_out_t, b_out_p)

    return out[:batch, :n_out].astype(jnp.float32)


def torcerebro_forward(x, w_in, b_in, w_h, b_h, w_out, b_out, *,
                       block_batch=1024):
    """Convenience wrapper: prep + apply (prefer caching prepare_* results)."""
    params, meta = prepare_torcerebro_params(w_in, b_in, w_h, b_h, w_out, b_out)
    return torcerebro_apply(params, meta, x, block_batch=block_batch)


def torcerebro_ref_f32(x, w_in, b_in, w_h, b_h, w_out, b_out):
    """Pure-JAX f32 reference matching the PyTorch forward."""
    h = x @ w_in.T + b_in
    for i in range(w_h.shape[0]):
        h = jnp.maximum(h, 0.0) @ w_h[i].T + b_h[i]
    h = jnp.maximum(h, 0.0)
    out = h @ w_out.T + b_out
    return jnp.maximum(out, 0.0)


def torcerebro_ref_bf16(x, w_in, b_in, w_h, b_h, w_out, b_out):
    """Reference mimicking the kernel's bf16-in / f32-accumulate matmuls."""
    bf = jnp.bfloat16
    h = jnp.dot(x.astype(bf), w_in.T.astype(bf),
                preferred_element_type=jnp.float32) + b_in
    for i in range(w_h.shape[0]):
        r = jnp.maximum(h, 0.0).astype(bf)
        h = jnp.dot(r, w_h[i].T.astype(bf),
                    preferred_element_type=jnp.float32) + b_h[i]
    r = jnp.maximum(h, 0.0).astype(bf)
    out = jnp.dot(r, w_out.T.astype(bf),
                  preferred_element_type=jnp.float32) + b_out
    # Mimic the kernel's bf16 writeback rounding.
    return jnp.maximum(out, 0.0).astype(bf).astype(jnp.float32)


if __name__ == "__main__":
    # Module hyper-parameters (small, consistent with the __init__ signature).
    qtdNeuroniosEntrada = 32
    qtdCamadas = 3
    profundidade = 64
    qtdNeuroniosSaida = 16
    batch = 8

    key = jax.random.PRNGKey(0)
    keys = jax.random.split(key, 8)

    # Deterministic parameter init (Linear-like uniform fan-in scaling).
    def init_linear(kw, kb, fan_out, fan_in):
        bound = 1.0 / jnp.sqrt(jnp.float32(fan_in))
        w = jax.random.uniform(kw, (fan_out, fan_in), jnp.float32, -bound, bound)
        b = jax.random.uniform(kb, (fan_out,), jnp.float32, -bound, bound)
        return w, b

    w_in, b_in = init_linear(keys[0], keys[1], profundidade, qtdNeuroniosEntrada)

    w_h_bound = 1.0 / jnp.sqrt(jnp.float32(profundidade))
    w_h = jax.random.uniform(keys[2], (qtdCamadas, profundidade, profundidade),
                             jnp.float32, -w_h_bound, w_h_bound)
    b_h = jax.random.uniform(keys[3], (qtdCamadas, profundidade),
                             jnp.float32, -w_h_bound, w_h_bound)

    w_out, b_out = init_linear(keys[4], keys[5], qtdNeuroniosSaida, profundidade)

    x = jax.random.normal(keys[6], (batch, qtdNeuroniosEntrada), jnp.float32)

    # One-time parameter prep (hoisted out of the per-call path), then apply.
    params, meta = prepare_torcerebro_params(w_in, b_in, w_h, b_h, w_out, b_out)
    apply_fn = functools.partial(torcerebro_apply, params, meta)

    out = apply_fn(x)
    out = jax.block_until_ready(out)
    assert out.shape == (batch, qtdNeuroniosSaida)

    # Tight check against a bf16-matmul / bf16-writeback mimicking reference.
    ref_bf16 = torcerebro_ref_bf16(x, w_in, b_in, w_h, b_h, w_out, b_out)
    assert jnp.allclose(out, ref_bf16, atol=2e-2, rtol=2e-2), \
        "mismatch vs bf16-matmul reference"

    # Looser sanity check against the exact f32 reference.
    ref_f32 = torcerebro_ref_f32(x, w_in, b_in, w_h, b_h, w_out, b_out)
    assert jnp.allclose(out, ref_f32, atol=5e-2, rtol=5e-2), \
        "mismatch vs f32 reference"

    # Exercise a larger / non-aligned batch path (multi-tile "parallel" grid).
    x_big = jax.random.normal(keys[7], (300, qtdNeuroniosEntrada), jnp.float32)
    out_big = jax.block_until_ready(apply_fn(x_big))
    ref_big = torcerebro_ref_bf16(x_big, w_in, b_in, w_h, b_h, w_out, b_out)
    assert out_big.shape == (300, qtdNeuroniosSaida)
    assert jnp.allclose(out_big, ref_big, atol=2e-2, rtol=2e-2), \
        "mismatch vs bf16 reference (large batch)"

    print("KERNEL_OK")
</pallas_src>

<mosaic_0001>
module attributes {stable_mosaic.version = 11 : i64} {
  func.func @mlp_kernel(%arg0: i32, %arg1: memref<16x32xbf16, #tpu.memory_space<vmem>>, %arg2: memref<32x128xbf16, #tpu.memory_space<vmem>>, %arg3: memref<1x128xf32, #tpu.memory_space<vmem>>, %arg4: memref<3x128x128xbf16, #tpu.memory_space<vmem>>, %arg5: memref<3x1x128xf32, #tpu.memory_space<vmem>>, %arg6: memref<128x128xbf16, #tpu.memory_space<vmem>>, %arg7: memref<1x128xf32, #tpu.memory_space<vmem>>, %arg8: memref<16x128xbf16, #tpu.memory_space<vmem>>) attributes {dimension_semantics = [#tpu.dimension_semantics<parallel>], iteration_bounds = array<i64: 1>, scalar_prefetch = 0 : i64, scratch_operands = 0 : i64, tpu.core_type = #tpu.core_type<tc>, window_params = [{transform_indices = @transform_0, window_bounds = array<i64: 16, 32>}, {pipeline_mode = #tpu.pipeline_mode<synchronous>, transform_indices = @transform_1, window_bounds = array<i64: 32, 128>}, {pipeline_mode = #tpu.pipeline_mode<synchronous>, transform_indices = @transform_2, window_bounds = array<i64: 1, 128>}, {pipeline_mode = #tpu.pipeline_mode<synchronous>, transform_indices = @transform_3, window_bounds = array<i64: 3, 128, 128>}, {pipeline_mode = #tpu.pipeline_mode<synchronous>, transform_indices = @transform_4, window_bounds = array<i64: 3, 1, 128>}, {pipeline_mode = #tpu.pipeline_mode<synchronous>, transform_indices = @transform_5, window_bounds = array<i64: 128, 128>}, {pipeline_mode = #tpu.pipeline_mode<synchronous>, transform_indices = @transform_6, window_bounds = array<i64: 1, 128>}, {transform_indices = @transform_7, window_bounds = array<i64: 16, 128>}]} {
    %c0 = arith.constant 0 : index
    %c0_0 = arith.constant 0 : index
    %0 = vector.load %arg1[%c0, %c0_0] : memref<16x32xbf16, #tpu.memory_space<vmem>>, vector<16x32xbf16>
    %c0_1 = arith.constant 0 : index
    %c0_2 = arith.constant 0 : index
    %1 = vector.load %arg2[%c0_1, %c0_2] : memref<32x128xbf16, #tpu.memory_space<vmem>>, vector<32x128xbf16>
    %cst = arith.constant dense<0.000000e+00> : vector<16x128xf32>
    %2 = tpu.matmul %0, %1, %cst {dimension_numbers = #tpu.dot_dimension_numbers<[1], [0], [0], [1], [0, 0, 1, 1], [], []>} : vector<16x32xbf16>, vector<32x128xbf16>, vector<16x128xf32> -> vector<16x128xf32>
    %c0_3 = arith.constant 0 : index
    %c0_4 = arith.constant 0 : index
    %3 = vector.load %arg3[%c0_3, %c0_4] : memref<1x128xf32, #tpu.memory_space<vmem>>, vector<1x128xf32>
    %4 = vector.broadcast %3 : vector<1x128xf32> to vector<16x128xf32>
    %5 = arith.addf %2, %4 : vector<16x128xf32>
    %cst_5 = arith.constant 0.000000e+00 : f32
    %6 = vector.broadcast %cst_5 : f32 to vector<16x128xf32>
    %7 = arith.maximumf %5, %6 : vector<16x128xf32>
    %8 = arith.truncf %7 : vector<16x128xf32> to vector<16x128xbf16>
    %c0_6 = arith.constant 0 : index
    %c0_7 = arith.constant 0 : index
    %c0_8 = arith.constant 0 : index
    %9 = vector.load %arg4[%c0_6, %c0_7, %c0_8] : memref<3x128x128xbf16, #tpu.memory_space<vmem>>, vector<1x128x128xbf16>
    %10 = vector.shape_cast %9 : vector<1x128x128xbf16> to vector<128x128xbf16>
    %cst_9 = arith.constant dense<0.000000e+00> : vector<16x128xf32>
    %11 = tpu.matmul %8, %10, %cst_9 {dimension_numbers = #tpu.dot_dimension_numbers<[1], [0], [0], [1], [0, 0, 1, 1], [], []>} : vector<16x128xbf16>, vector<128x128xbf16>, vector<16x128xf32> -> vector<16x128xf32>
    %c0_10 = arith.constant 0 : index
    %c0_11 = arith.constant 0 : index
    %c0_12 = arith.constant 0 : index
    %12 = vector.load %arg5[%c0_10, %c0_11, %c0_12] : memref<3x1x128xf32, #tpu.memory_space<vmem>>, vector<1x1x128xf32>
    %13 = vector.shape_cast %12 : vector<1x1x128xf32> to vector<1x128xf32>
    %14 = vector.broadcast %13 : vector<1x128xf32> to vector<16x128xf32>
    %15 = arith.addf %11, %14 : vector<16x128xf32>
    %cst_13 = arith.constant 0.000000e+00 : f32
    %16 = vector.broadcast %cst_13 : f32 to vector<16x128xf32>
    %17 = arith.maximumf %15, %16 : vector<16x128xf32>
    %18 = arith.truncf %17 : vector<16x128xf32> to vector<16x128xbf16>
    %c1 = arith.constant 1 : index
    %c0_14 = arith.constant 0 : index
    %c0_15 = arith.constant 0 : index
    %19 = vector.load %arg4[%c1, %c0_14, %c0_15] : memref<3x128x128xbf16, #tpu.memory_space<vmem>>, vector<1x128x128xbf16>
    %20 = vector.shape_cast %19 : vector<1x128x128xbf16> to vector<128x128xbf16>
    %cst_16 = arith.constant dense<0.000000e+00> : vector<16x128xf32>
    %21 = tpu.matmul %18, %20, %cst_16 {dimension_numbers = #tpu.dot_dimension_numbers<[1], [0], [0], [1], [0, 0, 1, 1], [], []>} : vector<16x128xbf16>, vector<128x128xbf16>, vector<16x128xf32> -> vector<16x128xf32>
    %c1_17 = arith.constant 1 : index
    %c0_18 = arith.constant 0 : index
    %c0_19 = arith.constant 0 : index
    %22 = vector.load %arg5[%c1_17, %c0_18, %c0_19] : memref<3x1x128xf32, #tpu.memory_space<vmem>>, vector<1x1x128xf32>
    %23 = vector.shape_cast %22 : vector<1x1x128xf32> to vector<1x128xf32>
    %24 = vector.broadcast %23 : vector<1x128xf32> to vector<16x128xf32>
    %25 = arith.addf %21, %24 : vector<16x128xf32>
    %cst_20 = arith.constant 0.000000e+00 : f32
    %26 = vector.broadcast %cst_20 : f32 to vector<16x128xf32>
    %27 = arith.maximumf %25, %26 : vector<16x128xf32>
    %28 = arith.truncf %27 : vector<16x128xf32> to vector<16x128xbf16>
    %c2 = arith.constant 2 : index
    %c0_21 = arith.constant 0 : index
    %c0_22 = arith.constant 0 : index
    %29 = vector.load %arg4[%c2, %c0_21, %c0_22] : memref<3x128x128xbf16, #tpu.memory_space<vmem>>, vector<1x128x128xbf16>
    %30 = vector.shape_cast %29 : vector<1x128x128xbf16> to vector<128x128xbf16>
    %cst_23 = arith.constant dense<0.000000e+00> : vector<16x128xf32>
    %31 = tpu.matmul %28, %30, %cst_23 {dimension_numbers = #tpu.dot_dimension_numbers<[1], [0], [0], [1], [0, 0, 1, 1], [], []>} : vector<16x128xbf16>, vector<128x128xbf16>, vector<16x128xf32> -> vector<16x128xf32>
    %c2_24 = arith.constant 2 : index
    %c0_25 = arith.constant 0 : index
    %c0_26 = arith.constant 0 : index
    %32 = vector.load %arg5[%c2_24, %c0_25, %c0_26] : memref<3x1x128xf32, #tpu.memory_space<vmem>>, vector<1x1x128xf32>
    %33 = vector.shape_cast %32 : vector<1x1x128xf32> to vector<1x128xf32>
    %34 = vector.broadcast %33 : vector<1x128xf32> to vector<16x128xf32>
    %35 = arith.addf %31, %34 : vector<16x128xf32>
    %cst_27 = arith.constant 0.000000e+00 : f32
    %36 = vector.broadcast %cst_27 : f32 to vector<16x128xf32>
    %37 = arith.maximumf %35, %36 : vector<16x128xf32>
    %38 = arith.truncf %37 : vector<16x128xf32> to vector<16x128xbf16>
    %c0_28 = arith.constant 0 : index
    %c0_29 = arith.constant 0 : index
    %39 = vector.load %arg6[%c0_28, %c0_29] : memref<128x128xbf16, #tpu.memory_space<vmem>>, vector<128x128xbf16>
    %cst_30 = arith.constant dense<0.000000e+00> : vector<16x128xf32>
    %40 = tpu.matmul %38, %39, %cst_30 {dimension_numbers = #tpu.dot_dimension_numbers<[1], [0], [0], [1], [0, 0, 1, 1], [], []>} : vector<16x128xbf16>, vector<128x128xbf16>, vector<16x128xf32> -> vector<16x128xf32>
    %c0_31 = arith.constant 0 : index
    %c0_32 = arith.constant 0 : index
    %41 = vector.load %arg7[%c0_31, %c0_32] : memref<1x128xf32, #tpu.memory_space<vmem>>, vector<1x128xf32>
    %42 = vector.broadcast %41 : vector<1x128xf32> to vector<16x128xf32>
    %43 = arith.addf %40, %42 : vector<16x128xf32>
    %cst_33 = arith.constant 0.000000e+00 : f32
    %44 = vector.broadcast %cst_33 : f32 to vector<16x128xf32>
    %45 = arith.maximumf %43, %44 : vector<16x128xf32>
    %46 = arith.truncf %45 : vector<16x128xf32> to vector<16x128xbf16>
    %c0_34 = arith.constant 0 : index
    %c0_35 = arith.constant 0 : index
    %47 = vector.load %arg8[%c0_34, %c0_35] : memref<16x128xbf16, #tpu.memory_space<vmem>>, vector<16x128xbf16>
    tpu.vector_store %arg8[%c0_34, %c0_35], %46 {strides = array<i32>} : memref<16x128xbf16, #tpu.memory_space<vmem>>, vector<16x128xbf16>,
    return
  }
  func.func @transform_0(%arg0: i32) -> (i32, i32) {
    %c0_i32 = arith.constant 0 : i32
    %c0_i32_0 = arith.constant 0 : i32
    return %arg0, %c0_i32 : i32, i32
  }
  func.func @transform_1(%arg0: i32) -> (i32, i32) {
    %c0_i32 = arith.constant 0 : i32
    %c0_i32_0 = arith.constant 0 : i32
    %c0_i32_1 = arith.constant 0 : i32
    return %c0_i32, %c0_i32_0 : i32, i32
  }
  func.func @transform_2(%arg0: i32) -> (i32, i32) {
    %c0_i32 = arith.constant 0 : i32
    %c0_i32_0 = arith.constant 0 : i32
    %c0_i32_1 = arith.constant 0 : i32
    return %c0_i32, %c0_i32_0 : i32, i32
  }
  func.func @transform_3(%arg0: i32) -> (i32, i32, i32) {
    %c0_i32 = arith.constant 0 : i32
    %c0_i32_0 = arith.constant 0 : i32
    %c0_i32_1 = arith.constant 0 : i32
    %c0_i32_2 = arith.constant 0 : i32
    return %c0_i32, %c0_i32_0, %c0_i32_1 : i32, i32, i32
  }
  func.func @transform_4(%arg0: i32) -> (i32, i32, i32) {
    %c0_i32 = arith.constant 0 : i32
    %c0_i32_0 = arith.constant 0 : i32
    %c0_i32_1 = arith.constant 0 : i32
    %c0_i32_2 = arith.constant 0 : i32
    return %c0_i32, %c0_i32_0, %c0_i32_1 : i32, i32, i32
  }
  func.func @transform_5(%arg0: i32) -> (i32, i32) {
    %c0_i32 = arith.constant 0 : i32
    %c0_i32_0 = arith.constant 0 : i32
    %c0_i32_1 = arith.constant 0 : i32
    return %c0_i32, %c0_i32_0 : i32, i32
  }
  func.func @transform_6(%arg0: i32) -> (i32, i32) {
    %c0_i32 = arith.constant 0 : i32
    %c0_i32_0 = arith.constant 0 : i32
    %c0_i32_1 = arith.constant 0 : i32
    return %c0_i32, %c0_i32_0 : i32, i32
  }
  func.func @transform_7(%arg0: i32) -> (i32, i32) {
    %c0_i32 = arith.constant 0 : i32
    %c0_i32_0 = arith.constant 0 : i32
    return %arg0, %c0_i32 : i32, i32
  }
}

</mosaic_0001>

<bundles_post_ra>
// kernel: tpu_custom_call.1
= control target key start
LH: loop header
LB: loop body
LE: loop exit
PB: predicated region body
PF: predicated region fallthrough
CT: control target
= control target key end

     0   :  { %12 = vsyncpa [#allocation3], 0  ;;  %s1191_s0 = inlined_call_operand.hbm [shape: bf16[16,32], index: 0, kind: input, shape index: {}]   ;;  %s1192_s1 = inlined_call_operand.hbm [shape: bf16[32,128], index: 1, kind: input, shape index: {}]   ;;  %s1193_s2 = inlined_call_operand.vmem [shape: f32[1,128], index: 2, kind: input, shape index: {}]   ;;  %s1194_s3 = inlined_call_operand.hbm [shape: bf16[3,128,128], index: 3, kind: input, shape index: {}]   ;;  %s1195_s4 = inlined_call_operand.vmem [shape: f32[3,1,128], index: 4, kind: input, shape index: {}]   ;;  %s1196_s5 = inlined_call_operand.hbm [shape: bf16[128,128], index: 5, kind: input, shape index: {}]   ;;  %s1197_s6 = inlined_call_operand.vmem [shape: f32[1,128], index: 6, kind: input, shape index: {}]   ;;  %s1198_s7 = inlined_call_operand.hbm [shape: bf16[16,128], index: 7, kind: output, shape index: {}]  }
   0x1   :  { %13 = vsyncpa [#allocation6], 0 }
   0x2   :  { %14 = vsyncpa [#allocation9], 0 }
   0x3   :  { %15 = vsyncpa [#allocation4], 0  ;;  %s994_s24 = smov [#allocation5]   ;;  %s995_s26 = smov [#allocation2]  }
   0x4   :  { %s33_s25 = sshll.u32 %s994_s24, 4  ;;  %s21_s27 = sshll.u32 %s995_s26, 4  ;;  %s34_s25 = int_to_ptr.vmem [resolvable:$true] %s33_s25  ;;  %s1043_s27 = int_to_ptr.vmem [resolvable:$true] %s21_s27 }
   0x5   :  { %s876_s30 = scalar_lea.hbm %s1192_s1, 256 }
   0x6   :  { %p877_p0 = scmp.ne.s32.totalorder %s1192_s1, %s876_s30  ;;  %p880_p1 = scmp.lt.u32.totalorder %s876_s30, %s1192_s1 }
   0x8   :  { %p882_p2 = pnand %p880_p1, %p877_p0 }
   0xa   :  { %885 = shalt.err (!%p882_p2)
}
   0xb   :  { %s886_s12 = scalar_lea.vmem %s34_s25, 256  ;;  %p891_p4 = scmp.lt.s32.totalorder %s34_s25, %s34_s25 }
   0xc   :  { %p887_p3 = scmp.ne.s32.totalorder %s34_s25, %s886_s12  ;;  %p892_p5 = scmp.lt.s32.totalorder %s886_s12, %s886_s12 }
   0xe   :  { %p893_p6 = por %p892_p5, %p891_p4 }
  0x10   :  { %p894_p7 = pnand %p893_p6, %p887_p3 }
  0x12   :  { %897 = shalt.err (!%p894_p7)
}
  0x13   :  { %s996_s13 = smov 64   ;;  %s997_s14 = smov 4  }
  0x14   :  { %39 = dma.hbm_to_vmem [thread:$0]  %s1192_s1, 256, %s34_s25, [#allocation6], %s996_s13, %s996_s13, %s997_s14  }
  0x15   :  { %s898_s19 = scalar_lea.hbm %s1191_s0, 128 }
  0x16   :  { %p899_p8 = scmp.ne.s32.totalorder %s1191_s0, %s898_s19  ;;  %p902_p9 = scmp.lt.u32.totalorder %s898_s19, %s1191_s0 }
  0x18   :  { %p904_p10 = pnand %p902_p9, %p899_p8 }
  0x1a   :  { %907 = shalt.err (!%p904_p10)
}
  0x1b   :  { %s908_s24 = scalar_lea.vmem %s1043_s27, 128  ;;  %p913_p12 = scmp.lt.s32.totalorder %s1043_s27, %s1043_s27 }
  0x1c   :  { %p909_p11 = scmp.ne.s32.totalorder %s1043_s27, %s908_s24  ;;  %p914_p13 = scmp.lt.s32.totalorder %s908_s24, %s908_s24 }
  0x1e   :  { %p915_p0 = por %p914_p13, %p913_p12 }
  0x20   :  { %p916_p1 = pnand %p915_p0, %p909_p11 }
  0x22   :  { %919 = shalt.err (!%p916_p1)
}
  0x23   :  { %27 = dma.hbm_to_vmem [thread:$0]  %s1191_s0, 128, %s1043_s27, [#allocation3], %s996_s13, %s996_s13, %s997_s14  }
  0x24   :  { %s998_s26 = smov [#allocation7]   ;;  %s999_s29 = smov [#allocation8]  }
  0x25   :  { %s47_s28 = sshll.u32 %s998_s26, 4  ;;  %s61_s30 = sshll.u32 %s999_s29, 4  ;;  %s48_s28 = int_to_ptr.vmem [resolvable:$true] %s47_s28  ;;  %s1080_s30 = int_to_ptr.vmem [resolvable:$true] %s61_s30 }
  0x26   :  { %s920_s10 = scalar_lea.hbm %s1194_s3, 3072 }
  0x27   :  { %p921_p2 = scmp.ne.s32.totalorder %s1194_s3, %s920_s10  ;;  %p924_p3 = scmp.lt.u32.totalorder %s920_s10, %s1194_s3 }
  0x29   :  { %p926_p4 = pnand %p924_p3, %p921_p2 }
  0x2b   :  { %929 = shalt.err (!%p926_p4)
}
  0x2c   :  { %s930_s0 = scalar_lea.vmem %s48_s28, 3072  ;;  %p935_p6 = scmp.lt.s32.totalorder %s48_s28, %s48_s28 }
  0x2d   :  { %p931_p5 = scmp.ne.s32.totalorder %s48_s28, %s930_s0  ;;  %p936_p7 = scmp.lt.s32.totalorder %s930_s0, %s930_s0 }
  0x2f   :  { %p937_p8 = por %p936_p7, %p935_p6 }
  0x31   :  { %p938_p9 = pnand %p937_p8, %p931_p5 }
  0x33   :  { %941 = shalt.err (!%p938_p9)
}
  0x34   :  { %53 = dma.hbm_to_vmem [thread:$0]  %s1194_s3, 3072, %s48_s28, [#allocation6], %s996_s13, %s996_s13, %s997_s14  }
  0x35   :  { %s942_s20 = scalar_lea.hbm %s1196_s5, 1024 }
  0x36   :  { %p943_p10 = scmp.ne.s32.totalorder %s1196_s5, %s942_s20  ;;  %p946_p11 = scmp.lt.u32.totalorder %s942_s20, %s1196_s5 }
  0x38   :  { %p948_p12 = pnand %p946_p11, %p943_p10 }
  0x3a   :  { %951 = shalt.err (!%p948_p12)
}
  0x3b   :  { %s952_s1 = scalar_lea.vmem %s1080_s30, 1024  ;;  %p957_p0 = scmp.lt.s32.totalorder %s1080_s30, %s1080_s30 }
  0x3c   :  { %p953_p13 = scmp.ne.s32.totalorder %s1080_s30, %s952_s1  ;;  %p958_p1 = scmp.lt.s32.totalorder %s952_s1, %s952_s1 }
  0x3e   :  { %p959_p2 = por %p958_p1, %p957_p0 }
  0x40   :  { %p960_p3 = pnand %p959_p2, %p953_p13 }
  0x42   :  { %963 = shalt.err (!%p960_p3)
}
  0x43   :  { %67 = dma.hbm_to_vmem [thread:$0]  %s1196_s5, 1024, %s1080_s30, [#allocation9], %s996_s13, %s996_s13, %s997_s14  }
  0x44   :  { %986 = dma.done.wait [#allocation3], 128  }
  0x45   :  { %987 = vsyncadd [#allocation3], 4294967168 }
  0x46   :  { %988 = dma.done.wait [#allocation6], 3328  }
  0x47   :  { %989 = vsyncadd [#allocation6], 4294963968 }
  0x48   :  { %990 = dma.done.wait [#allocation9], 1024  }
  0x49   :  { %991 = vsyncadd [#allocation9], 4294966272  ;;  %v1000_v0 = vmov 0.0   ;;  %vm1001_vm0 = vmmov 0   ;;  %v841_v1 = vld [vmem:[#allocation5] sm:$0xff]   ;;  %v842_v2 = vld [vmem:[#allocation5 + $0x8] sm:$0xff]  }
  0x4a   :  { %744 = vmatprep.subr.bf16.mxu0 %v1000_v0  ;;  %748 = vmatprep.mubr.msk.bf16.mxu0 %vm1001_vm0, %v1000_v0  ;;  %v844_v3 = vld [vmem:[#allocation7] sm:$0xff]   ;;  %v843_v4 = vld [vmem:[#allocation2] sm:$0xff]   ;;  %vm113_vm1 = vcmask 261120   ;;  %v846_v6 = vld [vmem:[#allocation7 + $0x10] sm:$0xff]  }
  0x4b   :  { %752 = vmatprep.subr.bf16.mxu1 %v1000_v0  ;;  %768 = vmatprep.mubr.msk.bf16.mxu1 %vm1001_vm0, %v1000_v0  ;;  %v845_v5 = vld [vmem:[#allocation7 + $0x8] sm:$0xff]   ;;  %v847_v7 = vld [vmem:[#allocation7 + $0x18] sm:$0xff]   ;;  %v848_v8 = vld [vmem:[#allocation7 + $0x20] sm:$0xff]  }
  0x4c   :  { %745 = vmatpush3.bf16.msra.mxu0 %v841_v1  ;;  %753 = vmatpush3.bf16.msra.mxu1 %v844_v3  ;;  %v849_v9 = vld [vmem:[#allocation7 + $0x28] sm:$0xff]   ;;  %v850_v10 = vld [vmem:[#allocation7 + $0x30] sm:$0xff]   ;;  %v851_v11 = vld [vmem:[#allocation7 + $0x38] sm:$0xff]  }
  0x4d   :  { %746 = vmatprep.subr.bf16.mxu0 %v1000_v0  ;;  %754 = vmatprep.subr.bf16.mxu1 %v1000_v0  ;;  %v852_v12 = vld [vmem:[#allocation7 + $0x40] sm:$0xff]   ;;  %v853_v13 = vld [vmem:[#allocation7 + $0x48] sm:$0xff]   ;;  %v854_v14 = vld [vmem:[#allocation7 + $0x50] sm:$0xff]  }
  0x4e   :  { %v855_v15 = vld [vmem:[#allocation7 + $0x58] sm:$0xff]   ;;  %v856_v16 = vld [vmem:[#allocation7 + $0x60] sm:$0xff]   ;;  %v857_v17 = vld [vmem:[#allocation7 + $0x68] sm:$0xff]  }
  0x4f   :  { %v653_v18 = vld [vmem:[%s1193_s2] ss:$0 sm:$0xff]  ;;  %v858_v28 = vld [vmem:[#allocation7 + $0x70] sm:$0xff]   ;;  %v859_v29 = vld [vmem:[#allocation7 + $0x78] sm:$0xff]  }
  0x50   :  { %747 = vmatpush3.bf16.msra.mxu0 %v842_v2  ;;  %755 = vmatpush3.bf16.msra.mxu1 %v845_v5  ;;  %v860_v30 = vld [vmem:[#allocation7 + $0x80] sm:$0xff]   ;;  %v861_v31 = vld [vmem:[#allocation7 + $0x88] sm:$0xff]   ;;  %v862_v32 = vld [vmem:[#allocation7 + $0x90] sm:$0xff]  }
  0x51   :  { %772 = vmatprep.subr.bf16.mxu0 %v1000_v0  ;;  %756 = vmatprep.subr.bf16.mxu1 %v1000_v0  ;;  %v863_v33 = vld [vmem:[#allocation7 + $0x98] sm:$0xff]   ;;  %v864_v34 = vld [vmem:[#allocation7 + $0xa0] sm:$0xff]   ;;  %v865_v35 = vld [vmem:[#allocation7 + $0xa8] sm:$0xff]  }
  0x52   :  { %v658_v36 = vld [vmem:[%s1195_s4] ss:$0 sm:$0xff]  ;;  %v866_v46 = vld [vmem:[#allocation7 + $0xb0] sm:$0xff]   ;;  %v867_v47 = vld [vmem:[#allocation7 + $0xb8] sm:$0xff]  }
  0x53   :  { %749 = vmatmul.mubr.msk.bf16.vlgmr.msra.gmra.mrb[0].mxu0 %vm113_vm1, %v843_v4  ;;  %v868_v48 = vld [vmem:[#allocation8] sm:$0xff]   ;;  %v869_v49 = vld [vmem:[#allocation8 + $0x8] sm:$0xff]   ;;  %v870_v50 = vld [vmem:[#allocation8 + $0x10] sm:$0xff]  }
  0x54   :  { %788 = vmatprep.mubr.msk.bf16.mxu0 %vm1001_vm0, %v1000_v0  ;;  %757 = vmatpush3.bf16.msra.mxu1 %v846_v6  ;;  %v871_v51 = vld [vmem:[#allocation8 + $0x18] sm:$0xff]   ;;  %v872_v52 = vld [vmem:[#allocation8 + $0x20] sm:$0xff]   ;;  %v873_v53 = vld [vmem:[#allocation8 + $0x28] sm:$0xff]  }
  0x55   :  { %758 = vmatprep.subr.bf16.mxu1 %v1000_v0  ;;  %773 = vmatpush3.bf16.msra.mxu0 %v852_v12  ;;  %v668_v54 = vld [vmem:[%s1195_s4 + $0x1] ss:$0 sm:$0xff]  ;;  %v874_v1 = vld [vmem:[#allocation8 + $0x30] sm:$0xff]   ;;  %v875_v2 = vld [vmem:[#allocation8 + $0x38] sm:$0xff]  }
  0x56   :  { %774 = vmatprep.subr.bf16.mxu0 %v1000_v0  ;;  %v678_v3 = vld [vmem:[%s1195_s4 + $0x2] ss:$0 sm:$0xff]  ;;  %s1002_s4 = smov [#allocation10]  }
  0x57   :  { %s639_s12 = sshll.u32 %s1002_s4, 4  ;;  %s640_s12 = int_to_ptr.vmem [resolvable:$true] %s639_s12 }
  0x58   :  { %759 = vmatpush3.bf16.msra.mxu1 %v847_v7  ;;  %s964_s15 = scalar_lea.vmem %s640_s12, 128  ;;  %p969_p5 = scmp.lt.s32.totalorder %s640_s12, %s640_s12 }
  0x59   :  { %760 = vmatprep.subr.bf16.mxu1 %v1000_v0  ;;  %775 = vmatpush3.bf16.msra.mxu0 %v853_v13  ;;  %p965_p4 = scmp.ne.s32.totalorder %s640_s12, %s964_s15  ;;  %p970_p6 = scmp.lt.s32.totalorder %s964_s15, %s964_s15 }
  0x5a   :  { %776 = vmatprep.subr.bf16.mxu0 %v1000_v0 }
  0x5b   :  { %p971_p7 = por %p970_p6, %p969_p5 }
  0x5c   :  { %761 = vmatpush3.bf16.msra.mxu1 %v848_v8 }
  0x5d   :  { %762 = vmatprep.subr.bf16.mxu1 %v1000_v0  ;;  %777 = vmatpush3.bf16.msra.mxu0 %v854_v14  ;;  %p972_p8 = pnand %p971_p7, %p965_p4 }
  0x5e   :  { %778 = vmatprep.subr.bf16.mxu0 %v1000_v0 }
  0x60   :  { %763 = vmatpush3.bf16.msra.mxu1 %v849_v9 }
  0x61   :  { %764 = vmatprep.subr.bf16.mxu1 %v1000_v0  ;;  %779 = vmatpush3.bf16.msra.mxu0 %v855_v15 }
  0x62   :  { %780 = vmatprep.subr.bf16.mxu0 %v1000_v0 }
  0x64   :  { %765 = vmatpush3.bf16.msra.mxu1 %v850_v10 }
  0x65   :  { %766 = vmatprep.subr.bf16.mxu1 %v1000_v0  ;;  %781 = vmatpush3.bf16.msra.mxu0 %v856_v16 }
  0x66   :  { %782 = vmatprep.subr.bf16.mxu0 %v1000_v0 }
  0x68   :  { %767 = vmatpush3.bf16.msra.mxu1 %v851_v11 }
  0x69   :  { %792 = vmatprep.subr.bf16.mxu1 %v1000_v0  ;;  %783 = vmatpush3.bf16.msra.mxu0 %v857_v17 }
  0x6a   :  { %784 = vmatprep.subr.bf16.mxu0 %v1000_v0 }
  0x6d   :  { %785 = vmatpush3.bf16.msra.mxu0 %v858_v28 }
  0x6e   :  { %786 = vmatprep.subr.bf16.mxu0 %v1000_v0 }
  0x71   :  { %787 = vmatpush3.bf16.msra.mxu0 %v859_v29 }
  0x72   :  { %812 = vmatprep.subr.bf16.mxu0 %v1000_v0 }
 0x126   :  { %v151_v19 = vpop.f32.mrb[0].mxu0 }
 0x127   :  { %v152_v20 = vadd.f32 %v653_v18, %v151_v19  ;;  %v750_v21 = vpop.f32.mrb[1].mxu0 }
 0x128   :  { %v154_v22 = vpop.f32.mrb[2].mxu0 }
 0x129   :  { %v155_v23 = vadd.f32 %v653_v18, %v154_v22  ;;  %v751_v24 = vpop.f32.mrb[3].mxu0  ;;  %v158_v25 = vmax.f32 %v152_v20, 0.0 }
 0x12b   :  { %v159_v26 = vmax.f32 %v155_v23, 0.0 }
 0x12d   :  { %v160_v27 = vpack.c.bf16 %v159_v26, %v158_v25 }
 0x12f   :  { %769 = vmatmul.mubr.bf16.vlgmr.msra.gmra.mrb[0].mxu1 %v160_v27 }
 0x130   :  { %808 = vmatprep.mubr.msk.bf16.mxu1 %vm1001_vm0, %v1000_v0  ;;  %793 = vmatpush3.bf16.msra.mxu1 %v860_v30 }
 0x131   :  { %794 = vmatprep.subr.bf16.mxu1 %v1000_v0 }
 0x134   :  { %795 = vmatpush3.bf16.msra.mxu1 %v861_v31 }
 0x135   :  { %796 = vmatprep.subr.bf16.mxu1 %v1000_v0 }
 0x138   :  { %797 = vmatpush3.bf16.msra.mxu1 %v862_v32 }
 0x139   :  { %798 = vmatprep.subr.bf16.mxu1 %v1000_v0 }
 0x13c   :  { %799 = vmatpush3.bf16.msra.mxu1 %v863_v33 }
 0x13d   :  { %800 = vmatprep.subr.bf16.mxu1 %v1000_v0 }
 0x140   :  { %801 = vmatpush3.bf16.msra.mxu1 %v864_v34 }
 0x141   :  { %802 = vmatprep.subr.bf16.mxu1 %v1000_v0 }
 0x144   :  { %803 = vmatpush3.bf16.msra.mxu1 %v865_v35 }
 0x145   :  { %804 = vmatprep.subr.bf16.mxu1 %v1000_v0 }
 0x148   :  { %805 = vmatpush3.bf16.msra.mxu1 %v866_v46 }
 0x149   :  { %806 = vmatprep.subr.bf16.mxu1 %v1000_v0 }
 0x14c   :  { %807 = vmatpush3.bf16.msra.mxu1 %v867_v47 }
 0x202   :  { %v266_v37 = vpop.f32.mrb[0].mxu1 }
 0x203   :  { %v267_v38 = vadd.f32 %v658_v36, %v266_v37  ;;  %v770_v39 = vpop.f32.mrb[1].mxu1 }
 0x204   :  { %v269_v40 = vpop.f32.mrb[2].mxu1 }
 0x205   :  { %v270_v41 = vadd.f32 %v658_v36, %v269_v40  ;;  %v771_v42 = vpop.f32.mrb[3].mxu1  ;;  %v273_v43 = vmax.f32 %v267_v38, 0.0 }
 0x207   :  { %v274_v44 = vmax.f32 %v270_v41, 0.0 }
 0x209   :  { %v275_v45 = vpack.c.bf16 %v274_v44, %v273_v43 }
 0x20b   :  { %789 = vmatmul.mubr.bf16.vlgmr.msra.gmra.mrb[4].mxu0 %v275_v45 }
 0x20c   :  { %828 = vmatprep.mubr.msk.bf16.mxu0 %vm1001_vm0, %v1000_v0  ;;  %813 = vmatpush3.bf16.msra.mxu0 %v868_v48 }
 0x20d   :  { %814 = vmatprep.subr.bf16.mxu0 %v1000_v0 }
 0x210   :  { %815 = vmatpush3.bf16.msra.mxu0 %v869_v49 }
 0x211   :  { %816 = vmatprep.subr.bf16.mxu0 %v1000_v0 }
 0x214   :  { %817 = vmatpush3.bf16.msra.mxu0 %v870_v50 }
 0x215   :  { %818 = vmatprep.subr.bf16.mxu0 %v1000_v0 }
 0x218   :  { %819 = vmatpush3.bf16.msra.mxu0 %v871_v51 }
 0x219   :  { %820 = vmatprep.subr.bf16.mxu0 %v1000_v0 }
 0x21c   :  { %821 = vmatpush3.bf16.msra.mxu0 %v872_v52 }
 0x21d   :  { %822 = vmatprep.subr.bf16.mxu0 %v1000_v0 }
 0x220   :  { %823 = vmatpush3.bf16.msra.mxu0 %v873_v53 }
 0x221   :  { %824 = vmatprep.subr.bf16.mxu0 %v1000_v0 }
 0x224   :  { %825 = vmatpush3.bf16.msra.mxu0 %v874_v1 }
 0x225   :  { %826 = vmatprep.subr.bf16.mxu0 %v1000_v0  ;;  %v687_v0 = vld [vmem:[%s1197_s6] ss:$0 sm:$0xff] }
 0x228   :  { %827 = vmatpush3.bf16.msra.mxu0 %v875_v2 }
 0x2de   :  { %v383_v55 = vpop.f32.mrb[4].mxu0 }
 0x2df   :  { %v384_v56 = vadd.f32 %v668_v54, %v383_v55  ;;  %v790_v57 = vpop.f32.mrb[5].mxu0 }
 0x2e0   :  { %v386_v58 = vpop.f32.mrb[6].mxu0 }
 0x2e1   :  { %v387_v59 = vadd.f32 %v668_v54, %v386_v58  ;;  %v791_v60 = vpop.f32.mrb[7].mxu0  ;;  %v390_v61 = vmax.f32 %v384_v56, 0.0 }
 0x2e3   :  { %v391_v62 = vmax.f32 %v387_v59, 0.0 }
 0x2e5   :  { %v392_v63 = vpack.c.bf16 %v391_v62, %v390_v61 }
 0x2e7   :  { %809 = vmatmul.mubr.bf16.vlgmr.msra.gmra.mrb[4].mxu1 %v392_v63 }
 0x3ba   :  { %v500_v4 = vpop.f32.mrb[4].mxu1 }
 0x3bb   :  { %v501_v5 = vadd.f32 %v678_v3, %v500_v4  ;;  %v810_v6 = vpop.f32.mrb[5].mxu1 }
 0x3bc   :  { %v503_v7 = vpop.f32.mrb[6].mxu1 }
 0x3bd   :  { %v504_v8 = vadd.f32 %v678_v3, %v503_v7  ;;  %v811_v9 = vpop.f32.mrb[7].mxu1  ;;  %v507_v10 = vmax.f32 %v501_v5, 0.0 }
 0x3bf   :  { %v508_v11 = vmax.f32 %v504_v8, 0.0 }
 0x3c1   :  { %v509_v12 = vpack.c.bf16 %v508_v11, %v507_v10 }
 0x3c3   :  { %829 = vmatmul.mubr.bf16.vlgmr.msra.gmra.mrb[8].mxu0 %v509_v12 }
 0x496   :  { %v615_v13 = vpop.f32.mrb[8].mxu0 }
 0x497   :  { %v616_v14 = vadd.f32 %v687_v0, %v615_v13  ;;  %v830_v15 = vpop.f32.mrb[9].mxu0 }
 0x498   :  { %v618_v16 = vpop.f32.mrb[10].mxu0 }
 0x499   :  { %v619_v17 = vadd.f32 %v687_v0, %v618_v16  ;;  %v831_v18 = vpop.f32.mrb[11].mxu0  ;;  %v622_v19 = vmax.f32 %v616_v14, 0.0 }
 0x49b   :  { %v623_v20 = vmax.f32 %v619_v17, 0.0 }
 0x49d   :  { %v703_v21 = vpack.c.bf16 %v623_v20, %v622_v19 }
 0x49f   :  { %704 = vst [vmem:[#allocation10] sm:$0xff] %v703_v21  }
 0x4a0   :  { %975 = shalt.err (!%p972_p8)
}
 0x4a1   :  { %s976_s0 = scalar_lea.hbm %s1198_s7, 128 }
 0x4a2   :  { %p977_p9 = scmp.ne.s32.totalorder %s1198_s7, %s976_s0  ;;  %p980_p10 = scmp.lt.u32.totalorder %s976_s0, %s1198_s7 }
 0x4a4   :  { %p982_p11 = pnand %p980_p10, %p977_p9 }
 0x4a6   :  { %985 = shalt.err (!%p982_p11)
}
 0x4a7   :  { %645 = dma.vmem_to_hbm [thread:$0]  %s640_s12, 128, %s1198_s7, [#allocation4], %s996_s13, %s996_s13, %s997_s14  }
 0x4a8   :  { %992 = dma.done.wait [#allocation4], 128  }
 0x4a9   :  { %993 = vsyncadd [#allocation4], 4294967168 }
 0x4aa   :  { %649 = vsyncpa [#allocation3], 1 }
 0x4ab   :  { %650 = vsyncpa [#allocation6], 1 }
 0x4ac   :  { %651 = vsyncpa [#allocation9], 1 }
 0x4ad   :  { %652 = vsyncpa [#allocation4], 1 }

</bundles_post_ra>
